<compile_context>
chip_gen: v5e
topology: v5e:2x2
jax: 0.10.0
libtpu: 0.0.40
codegen_flags: <defaults>
</compile_context>

<pallas_src>
import functools

import jax
import jax.numpy as jnp
from jax.experimental import pallas as pl
from jax.experimental.pallas import tpu as pltpu

C_CONST = 0.85  # self.c in the PyTorch module


def gcn_kernel(x_ref, adj_ref, w_ref, eye_ref, out_ref, *, matmul_dtype):
    bt, n, _ = adj_ref.shape          # (BT, N, N)
    d = w_ref.shape[1]                # out_dim

    def mm_cast(v):
        return v if matmul_dtype is None else v.astype(matmul_dtype)

    # --- MXU: one large XW matmul, M = BT*N, f32 accumulation. ---------------
    xw = jnp.dot(
        mm_cast(x_ref[...]),          # (BT*N, in_dim)
        mm_cast(w_ref[...]),          # (in_dim, out_dim)
        preferred_element_type=jnp.float32,
    )                                 # (BT*N, out_dim)
    # Split only the leading (sublane) dim; last dim is unchanged.
    xw = xw.reshape(bt, n, d)         # (BT, N, out_dim)

    # --- MXU: batched adj @ XW over the BT block. ----------------------------
    axw = jnp.einsum(
        "bnm,bmo->bno",
        mm_cast(adj_ref[...]),        # (BT, N, N)
        mm_cast(xw),                  # (BT, N, out_dim)
        preferred_element_type=jnp.float32,
    )                                 # (BT, N, out_dim)

    # --- VPU/EUP epilogue: eye + c*AXW, relu, column-mean norm, softplus. ----
    i_caxw = eye_ref[...][None, :, :] + C_CONST * axw
    y_relu = jnp.maximum(i_caxw, 0.0)
    col_mean = jnp.mean(y_relu, axis=1, keepdims=True) + 1e-06   # (BT, 1, D)
    y_norm = y_relu * pl.reciprocal(col_mean, approx=True)       # EUP recip
    out_ref[...] = jax.nn.softplus(y_norm).astype(out_ref.dtype)

    # TODO(synk): neg_penalty regularization loss (self.losses.append(...)) is a
    # training-time side effect not returned by forward; not emitted here.
    # TODO(synk): the `x is None` branch (AXW = adj @ W) is not implemented.


def _pick_block_b(B, N, in_dim, out_dim, *, target_bytes=2 << 20):
    """Pick batch-block size so the per-step working set is ~1-4 MiB."""
    per_batch = 4 * (N * in_dim + N * N + N * out_dim)   # f32 bytes per element
    bt = max(1, min(B, target_bytes // max(per_batch, 1)))
    # Keep at least 2 grid steps so the "parallel" axis can feed both v7x
    # TensorCores and the pipeline has something to overlap.
    bt = min(bt, max(1, B // 2))
    while B % bt != 0:
        bt -= 1
    return bt


def gcn_forward(x, adj, W, *, block_b=None, matmul_dtype=jnp.bfloat16):
    B, N, in_dim = x.shape
    out_dim = W.shape[1]
    assert adj.shape == (B, N, N)
    assert out_dim == N, "PyTorch broadcast eye(N) + c*AXW requires out_dim == N"

    if block_b is None:
        block_b = _pick_block_b(B, N, in_dim, out_dim)
    assert B % block_b == 0, (B, block_b)

    # Precomputed identity kept resident across all grid steps (constant index_map).
    eye = jnp.eye(N, out_dim, dtype=jnp.float32)
    # Flatten (B, N, in_dim) -> (B*N, in_dim) outside the kernel so the XW
    # matmul has a large M dim with no in-kernel relayout.
    x2d = x.reshape(B * N, in_dim)

    kernel = functools.partial(gcn_kernel, matmul_dtype=matmul_dtype)

    # NOTE: for large N on v7x (64 MiB VMEM), tile adj rows with a second
    # "arbitrary" grid axis or raise vmem_limit_bytes; not needed at these sizes.
    return pl.pallas_call(
        kernel,
        out_shape=jax.ShapeDtypeStruct((B, N, out_dim), jnp.float32),
        grid_spec=pltpu.PrefetchScalarGridSpec(
            num_scalar_prefetch=0,
            grid=(B // block_b,),
            in_specs=[
                pl.BlockSpec((block_b * N, in_dim), lambda b: (b, 0)),
                pl.BlockSpec((block_b, N, N), lambda b: (b, 0, 0)),
                pl.BlockSpec((in_dim, out_dim), lambda b: (0, 0)),
                pl.BlockSpec((N, out_dim), lambda b: (0, 0)),
            ],
            out_specs=pl.BlockSpec((block_b, N, out_dim), lambda b: (b, 0, 0)),
        ),
        compiler_params=pltpu.CompilerParams(
            dimension_semantics=("parallel",),
        ),
    )(x2d, adj, W, eye)


def gcn_reference(x, adj, W, matmul_dtype=None):
    """Pure-JAX reference mirroring the PyTorch forward.

    If matmul_dtype is given, matmul operands are cast the same way the kernel
    does (bf16 inputs, f32 accumulation) so the comparison isolates kernel bugs
    from expected low-precision rounding.
    """
    N = adj.shape[-1]
    if matmul_dtype is not None:
        xw = jnp.einsum("bni,io->bno", x.astype(matmul_dtype),
                        W.astype(matmul_dtype),
                        preferred_element_type=jnp.float32)
        axw = jnp.einsum("bnm,bmo->bno", adj.astype(matmul_dtype),
                         xw.astype(matmul_dtype),
                         preferred_element_type=jnp.float32)
    else:
        xw = jnp.einsum("bni,io->bno", x, W)
        axw = jnp.einsum("bnm,bmo->bno", adj, xw)
    i_caxw = jnp.eye(N, dtype=jnp.float32) + C_CONST * axw
    y_relu = jnp.maximum(i_caxw, 0.0)
    col_mean = jnp.mean(y_relu, axis=-2, keepdims=True) + 1e-06
    y_norm = y_relu / col_mean
    return jax.nn.softplus(y_norm)


if __name__ == "__main__":
    # Small shapes consistent with the module: B graphs, N nodes, node features
    # of size in_dim; out_dim must equal N for the eye() broadcast.  B=8 so the
    # batch-blocking picks BT=4 -> grid=(2,) (both TCs busy on v7x).
    B, N, in_dim = 8, 16, 16
    out_dim = N

    key = jax.random.PRNGKey(0)
    kx, ka, kw = jax.random.split(key, 3)

    x = jax.random.normal(kx, (B, N, in_dim), dtype=jnp.float32)
    adj_raw = jax.random.uniform(ka, (B, N, N), dtype=jnp.float32)
    adj = 0.5 * (adj_raw + jnp.swapaxes(adj_raw, -1, -2))  # symmetric adjacency
    # Deterministic parameter init (nn.Parameter(FloatTensor(in_dim, out_dim))).
    W = 0.1 * jax.random.normal(kw, (in_dim, out_dim), dtype=jnp.float32)

    out = gcn_forward(x, adj, W)
    out = jax.block_until_ready(out)
    assert out.shape == (B, N, out_dim)

    # Tight check vs. a reference using the same bf16-matmul / f32-accum recipe.
    ref_mixed = gcn_reference(x, adj, W, matmul_dtype=jnp.bfloat16)
    assert jnp.allclose(out, ref_mixed, atol=3e-2, rtol=3e-2), (
        float(jnp.max(jnp.abs(out - ref_mixed))))

    # Loose sanity check vs. the full-f32 reference (bf16 matmul rounding).
    ref_f32 = gcn_reference(x, adj, W)
    assert jnp.allclose(out, ref_f32, atol=1.5e-1, rtol=1e-1), (
        float(jnp.max(jnp.abs(out - ref_f32))))

    print("KERNEL_OK")
</pallas_src>

<mosaic_0001>
module attributes {stable_mosaic.version = 11 : i64} {
  func.func @gcn_kernel(%arg0: i32, %arg1: memref<64x16xf32, #tpu.memory_space<vmem>>, %arg2: memref<4x16x16xf32, #tpu.memory_space<vmem>>, %arg3: memref<16x16xf32, #tpu.memory_space<vmem>>, %arg4: memref<16x16xf32, #tpu.memory_space<vmem>>, %arg5: memref<4x16x16xf32, #tpu.memory_space<vmem>>) attributes {dimension_semantics = [#tpu.dimension_semantics<parallel>], iteration_bounds = array<i64: 2>, scalar_prefetch = 0 : i64, scratch_operands = 0 : i64, tpu.core_type = #tpu.core_type<tc>, window_params = [{transform_indices = @transform_0, window_bounds = array<i64: 64, 16>}, {transform_indices = @transform_1, window_bounds = array<i64: 4, 16, 16>}, {pipeline_mode = #tpu.pipeline_mode<synchronous>, transform_indices = @transform_2, window_bounds = array<i64: 16, 16>}, {pipeline_mode = #tpu.pipeline_mode<synchronous>, transform_indices = @transform_3, window_bounds = array<i64: 16, 16>}, {transform_indices = @transform_4, window_bounds = array<i64: 4, 16, 16>}]} {
    %c0 = arith.constant 0 : index
    %c0_0 = arith.constant 0 : index
    %0 = vector.load %arg1[%c0, %c0_0] : memref<64x16xf32, #tpu.memory_space<vmem>>, vector<64x16xf32>
    %1 = arith.truncf %0 : vector<64x16xf32> to vector<64x16xbf16>
    %c0_1 = arith.constant 0 : index
    %c0_2 = arith.constant 0 : index
    %2 = vector.load %arg3[%c0_1, %c0_2] : memref<16x16xf32, #tpu.memory_space<vmem>>, vector<16x16xf32>
    %3 = arith.truncf %2 : vector<16x16xf32> to vector<16x16xbf16>
    %cst = arith.constant dense<0.000000e+00> : vector<64x16xf32>
    %4 = tpu.matmul %1, %3, %cst {dimension_numbers = #tpu.dot_dimension_numbers<[1], [0], [0], [1], [0, 0, 1, 1], [], []>} : vector<64x16xbf16>, vector<16x16xbf16>, vector<64x16xf32> -> vector<64x16xf32>
    %5 = vector.shape_cast %4 : vector<64x16xf32> to vector<4x16x16xf32>
    %c0_3 = arith.constant 0 : index
    %c0_4 = arith.constant 0 : index
    %c0_5 = arith.constant 0 : index
    %6 = vector.load %arg2[%c0_3, %c0_4, %c0_5] : memref<4x16x16xf32, #tpu.memory_space<vmem>>, vector<4x16x16xf32>
    %7 = arith.truncf %6 : vector<4x16x16xf32> to vector<4x16x16xbf16>
    %8 = arith.truncf %5 : vector<4x16x16xf32> to vector<4x16x16xbf16>
    "tpu.trace_start"() <{level = 10 : i32, message = "bnm,bmo->bno"}> : () -> ()
    %cst_6 = arith.constant dense<0.000000e+00> : vector<4x16x16xf32>
    %9 = tpu.matmul %7, %8, %cst_6 {dimension_numbers = #tpu.dot_dimension_numbers<[2], [1], [1], [2], [0, 0, 0, 1, 1, 2], [0], [0]>} : vector<4x16x16xbf16>, vector<4x16x16xbf16>, vector<4x16x16xf32> -> vector<4x16x16xf32>
    "tpu.trace_stop"() : () -> ()
    %c0_7 = arith.constant 0 : index
    %c0_8 = arith.constant 0 : index
    %10 = vector.load %arg4[%c0_7, %c0_8] : memref<16x16xf32, #tpu.memory_space<vmem>>, vector<16x16xf32>
    %11 = vector.shape_cast %10 : vector<16x16xf32> to vector<1x16x16xf32>
    %cst_9 = arith.constant 8.500000e-01 : f32
    %12 = vector.broadcast %cst_9 : f32 to vector<4x16x16xf32>
    %13 = arith.mulf %12, %9 : vector<4x16x16xf32>
    %14 = vector.broadcast %11 : vector<1x16x16xf32> to vector<4x16x16xf32>
    %15 = arith.addf %14, %13 : vector<4x16x16xf32>
    %cst_10 = arith.constant 0.000000e+00 : f32
    %16 = vector.broadcast %cst_10 : f32 to vector<4x16x16xf32>
    %17 = arith.maximumf %15, %16 : vector<4x16x16xf32>
    %cst_11 = arith.constant dense<0.000000e+00> : vector<4x16xf32>
    %18 = vector.multi_reduction <add>, %17, %cst_11 [1] : vector<4x16x16xf32> to vector<4x16xf32>
    %19 = vector.shape_cast %18 : vector<4x16xf32> to vector<4x1x16xf32>
    %cst_12 = arith.constant 1.600000e+01 : f32
    %20 = vector.broadcast %cst_12 : f32 to vector<4x1x16xf32>
    %21 = arith.divf %19, %20 : vector<4x1x16xf32>
    %cst_13 = arith.constant 9.99999997E-7 : f32
    %22 = vector.broadcast %cst_13 : f32 to vector<4x1x16xf32>
    %23 = arith.addf %21, %22 : vector<4x1x16xf32>
    %24 = tpu.reciprocal %23 {approx = true} : vector<4x1x16xf32> -> vector<4x1x16xf32>
    %25 = vector.broadcast %24 : vector<4x1x16xf32> to vector<4x16x16xf32>
    %26 = arith.mulf %17, %25 : vector<4x16x16xf32>
    %cst_14 = arith.constant 0.000000e+00 : f32
    %27 = vector.broadcast %cst_14 : f32 to vector<4x16x16xf32>
    %28 = arith.maximumf %26, %27 : vector<4x16x16xf32>
    %29 = vector.broadcast %cst_14 : f32 to vector<4x16x16xf32>
    %30 = arith.subf %26, %29 : vector<4x16x16xf32>
    %31 = arith.cmpf one, %30, %30 : vector<4x16x16xf32>
    %32 = vector.broadcast %cst_14 : f32 to vector<4x16x16xf32>
    %33 = arith.addf %26, %32 : vector<4x16x16xf32>
    %34 = math.absf %30 : vector<4x16x16xf32>
    %cst_15 = arith.constant 0.000000e+00 : f32
    %35 = vector.broadcast %cst_15 : f32 to vector<4x16x16xf32>
    %36 = arith.subf %35, %34 : vector<4x16x16xf32>
    %37 = math.exp %36 : vector<4x16x16xf32>
    %38 = math.log1p %37 : vector<4x16x16xf32>
    %39 = arith.addf %28, %38 : vector<4x16x16xf32>
    %40 = arith.select %31, %33, %39 : vector<4x16x16xi1>, vector<4x16x16xf32>
    %c0_16 = arith.constant 0 : index
    %c0_17 = arith.constant 0 : index
    %c0_18 = arith.constant 0 : index
    %41 = vector.load %arg5[%c0_16, %c0_17, %c0_18] : memref<4x16x16xf32, #tpu.memory_space<vmem>>, vector<4x16x16xf32>
    tpu.vector_store %arg5[%c0_16, %c0_17, %c0_18], %40 {strides = array<i32>} : memref<4x16x16xf32, #tpu.memory_space<vmem>>, vector<4x16x16xf32>,
    return
  }
  func.func @transform_0(%arg0: i32) -> (i32, i32) {
    %c0_i32 = arith.constant 0 : i32
    %c0_i32_0 = arith.constant 0 : i32
    return %arg0, %c0_i32 : i32, i32
  }
  func.func @transform_1(%arg0: i32) -> (i32, i32, i32) {
    %c0_i32 = arith.constant 0 : i32
    %c0_i32_0 = arith.constant 0 : i32
    %c0_i32_1 = arith.constant 0 : i32
    return %arg0, %c0_i32, %c0_i32_0 : i32, i32, i32
  }
  func.func @transform_2(%arg0: i32) -> (i32, i32) {
    %c0_i32 = arith.constant 0 : i32
    %c0_i32_0 = arith.constant 0 : i32
    %c0_i32_1 = arith.constant 0 : i32
    return %c0_i32, %c0_i32_0 : i32, i32
  }
  func.func @transform_3(%arg0: i32) -> (i32, i32) {
    %c0_i32 = arith.constant 0 : i32
    %c0_i32_0 = arith.constant 0 : i32
    %c0_i32_1 = arith.constant 0 : i32
    return %c0_i32, %c0_i32_0 : i32, i32
  }
  func.func @transform_4(%arg0: i32) -> (i32, i32, i32) {
    %c0_i32 = arith.constant 0 : i32
    %c0_i32_0 = arith.constant 0 : i32
    %c0_i32_1 = arith.constant 0 : i32
    return %arg0, %c0_i32, %c0_i32_0 : i32, i32, i32
  }
}

</mosaic_0001>

<bundles_post_ra>
// kernel: tpu_custom_call.1
= control target key start
LH: loop header
LB: loop body
LE: loop exit
PB: predicated region body
PF: predicated region fallthrough
CT: control target
= control target key end

     0   :  { %9 = vsyncpa [#allocation3], 0  ;;  %s1307_s0 = inlined_call_operand.vmem [shape: f32[128,16], index: 0, kind: input, shape index: {}]   ;;  %s1308_s1 = inlined_call_operand.vmem [shape: f32[8,16,16], index: 1, kind: input, shape index: {}]   ;;  %s1309_s2 = inlined_call_operand.vmem [shape: f32[16,16], index: 2, kind: input, shape index: {}]   ;;  %s1310_s3 = inlined_call_operand.hbm [shape: f32[16,16], index: 3, kind: input, shape index: {}]   ;;  %s1311_s4 = inlined_call_operand.hbm [shape: f32[8,16,16], index: 4, kind: output, shape index: {}]  }
   0x1   :  { %10 = vsyncpa [#allocation4], 0 }
   0x2   :  { %12 = vsyncpa [#allocation4 + $0x1], 0  ;;  %s1036_s15 = smov 0   ;;  %s1038_s16 = smov 0  }
   0x3   :  { %s1040_s17 = smov 0   ;;  %s1042_s18 = smov 0  }
   0x4 LB: > { %s1057_s19 = sadd.s32 4294967295, %s1003_s18   ;;  %s779_s20 = sadd.s32 4294967294, %s1003_s18   ;;  %s1003_s18 = sphi %s1042_s18, %s1317_s18   ;;  %s999_s17 = sphi %s1040_s17, %s1316_s17   ;;  %s995_s16 = sphi %s1038_s16, %s1315_s16   ;;  %s991_s15 = sphi %s1036_s15, %s1314_s15  }
   0x5   : > { %s1061_s21 = sadd.s32 1, %s1003_s18   ;;  %s119_s22 = sadd.s32 1, %s999_s17 }
   0x6   : > { %s116_s23 = ssub.s32 %s1003_s18, %s1061_s21  ;;  %p129_p0 = scmp.ne.s32.totalorder %s999_s17, %s995_s16 }
   0x7   : > { %p117_p1 = scmp.eq.s32.totalorder %s116_s23, 0  ;;  %p130_p2 = scmp.eq.s32.totalorder %s1057_s19, 1 }
   0x8   : > { %p135_p3 = scmp.ne.s32.totalorder %s995_s16, %s991_s15  ;;  %p136_p4 = scmp.eq.s32.totalorder %s779_s20, 1 }
   0x9   : > { %s1072_s24 = scalar_select %p117_p1, %s999_s17, %s119_s22  }
   0xa   : > { %p1074_p5 = por %p130_p2, %p129_p0  ;;  %p1078_p6 = por %p136_p4, %p135_p3 }
   0xb   : > { %p780_p7 = scmp.ge.s32.totalorder %s1003_s18, 1  ;;  %p143_p8 = scmp.lt.s32.totalorder %s1003_s18, 3 }
   0xc   : > { %p824_p9 = scmp.eq.s32.totalorder %s1057_s19, 0  ;;  %s157_s29 = sshll.u32 %s1310_s3, 4  ;;  %s158_s29 = int_to_ptr.hbm [resolvable:$true] %s157_s29 }
   0xd   : > { %p144_p10 = pnand %p780_p7, %p143_p8  ;;  %s1005_s30 = smov [#allocation2]  }
   0xe   : > { %s159_s5 = sshll.u32 %s1005_s30, 4  ;;  %s1006_s6 = smov 128   ;;  %s160_s5 = int_to_ptr.vmem [resolvable:$true] %s159_s5 }
   0xf   : > { %p816_p11 = pneg %p144_p10  ;;  %s1007_s7 = smov 8  }
  0x10   : > { %194 = sbr.rel (%p144_p10) target bundleno = 410 (0x19a), region = 36 }
  0x11   : > { %p817_p12 = pnand %p824_p9, %p816_p11 }
  0x13   : > { %819 = dma.hbm_to_vmem [thread:$0]  (!%p817_p12), %s158_s29, 256, %s160_s5, [#allocation3], %s1006_s6, %s1006_s6, %s1007_s7  }
  0x15   : > { %982 = dma.done.wait (%p824_p9), [#allocation3], 256  }
  0x16   : > { %984 = vsyncadd (%p824_p9), [#allocation3], 4294967040  ;;  %s786_s8 = sshll.u32 %s1057_s19, 3  ;;  %v254_v0 = vld [vmem:[%s1309_s2] sm:$0xff]  ;;  %v255_v1 = vld [vmem:[%s1309_s2 + $0x8] sm:$0xff]  ;;  %vm257_vm0 = vcmask 130048  }
  0x17   : > { %p228_p13 = scmp.lt.s32.totalorder %s786_s8, 15  ;;  %v256_v3 = vpack.c.bf16 %v255_v1, %v254_v0  ;;  %s788_s23 = sshll.u32 %s1057_s19, 2 }
  0x18   : > { %p234_p0 = scmp.lt.s32.totalorder %s788_s23, 7  ;;  %s224_s5 = sand.u32 1, %s995_s16  }
  0x19   : > { %s1319_s8 = smov (!%p228_p13, %s786_s8), 15  ;;  %277 = vmatpush.bf16.msra.mxu0 %v256_v3  ;;  %808 = vmatpush.bf16.msra.mxu2 %v256_v3  ;;  %s785_s6 = sshll.u32 %s224_s5, 6 }
  0x1a   : > { %s787_s9 = sshll.u32 %s1319_s8, 3  ;;  %809 = vmatpush.bf16.msra.mxu3 %v256_v3  ;;  %s1321_s23 = smov (!%p234_p0, %s788_s23), 7 }
  0x1b   : > { %s231_s12 = scalar_lea.vmem %s1307_s0, %s787_s9  ;;  %s805_s27 = sshll.u32 %s1321_s23, 4 }
  0x1c   : > { %v242_v2 = vld [vmem:[%s231_s12] sm:$0xff]  ;;  %v243_v4 = vld [vmem:[%s231_s12 + $0x8] sm:$0xff]  ;;  %v248_v9 = vld [vmem:[%s231_s12 + $0x30] sm:$0xff]  ;;  %s1112_s30 = scalar_lea.vmem %s1308_s1, %s805_s27  ;;  %s1221_s7 = scalar_lea.vmem [#allocation5], %s785_s6 }
  0x1d   : > { %v246_v5 = vld [vmem:[%s231_s12 + $0x20] sm:$0xff]  ;;  %v247_v6 = vld [vmem:[%s231_s12 + $0x28] sm:$0xff]  ;;  %v250_v7 = vpack.c.bf16 %v243_v4, %v242_v2  ;;  %v249_v10 = vld [vmem:[%s231_s12 + $0x38] sm:$0xff]  ;;  %s807_s8 = sshll.u32 %s1057_s19, 6  ;;  %s690_s19 = sshll.u32 %s1221_s7, 4  ;;  %s691_s19 = int_to_ptr.vmem [resolvable:$true] %s690_s19 }
  0x1e   : > { %v252_v8 = vpack.c.bf16 %v247_v6, %v246_v5  ;;  %v253_v11 = vpack.c.bf16 %v249_v10, %v248_v9  ;;  %v244_v12 = vld [vmem:[%s231_s12 + $0x10] sm:$0xff]  ;;  %v245_v13 = vld [vmem:[%s231_s12 + $0x18] sm:$0xff]  ;;  %v299_v16 = vld [vmem:[%s1112_s30] sm:$0xff]  ;;  %s689_s11 = scalar_lea.hbm %s1311_s4, %s807_s8  ;;  %s677_s13 = scalar_lea.sflag [#allocation4], %s224_s5 }
  0x1f   : > { %791 = vmatmul.msk.bf16.vlgmr.msra.gmra.mxu0 %vm257_vm0, %v250_v7  ;;  %v251_v14 = vpack.c.bf16 %v245_v13, %v244_v12  ;;  %v300_v17 = vld [vmem:[%s1112_s30 + $0x8] sm:$0xff]  ;;  %v307_v19 = vpack.c.bf16 %v299_v16, %v299_v16  ;;  %v303_v25 = vld [vmem:[%s1112_s30 + $0x20] sm:$0xff]  ;;  %v301_v48 = vld [vmem:[%s1112_s30 + $0x10] sm:$0xff]  ;;  %s692_s12 = sshll.u32 %s689_s11, 4  ;;  %s957_s27 = scalar_lea.hbm %s1311_s4, 128  ;;  %s693_s12 = int_to_ptr.hbm [resolvable:$true] %s692_s12 }
  0x20   : > { %793 = vmatmul.msk.bf16.vlgmr.msra.gmra.mxu2 %vm257_vm0, %v252_v8  ;;  %794 = vmatmul.msk.bf16.vlgmr.msra.gmra.mxu3 %vm257_vm0, %v253_v11  ;;  %v308_v20 = vpack.c.bf16 %v300_v17, %v300_v17  ;;  %v304_v26 = vld [vmem:[%s1112_s30 + $0x28] sm:$0xff]  ;;  %v311_v33 = vpack.c.bf16 %v303_v25, %v303_v25  ;;  %v302_v50 = vld [vmem:[%s1112_s30 + $0x18] sm:$0xff]  ;;  %v305_v51 = vld [vmem:[%s1112_s30 + $0x30] sm:$0xff]  ;;  %v309_v55 = vpack.c.bf16 %v301_v48, %v301_v48  ;;  %v1008_v8 = vmov 16.0   ;;  %s951_s14 = sshra.s32 %s693_s12, 4  ;;  %s952_s14 = int_to_ptr.hbm [resolvable:$true] %s951_s14 }
  0x21   : > { %v325_v27 = vunpack.c.l.b16 %v307_v19  ;;  %v312_v34 = vpack.c.bf16 %v304_v26, %v304_v26  ;;  %v306_v52 = vld [vmem:[%s1112_s30 + $0x38] sm:$0xff]  ;;  %v310_v56 = vpack.c.bf16 %v302_v50, %v302_v50  ;;  %v313_v57 = vpack.c.bf16 %v305_v51, %v305_v51  ;;  %v435_v10 = vld [vmem:[#allocation2] sm:$0xff]  ;;  %s953_s20 = scalar_lea.hbm %s952_s14, 64  ;;  %p958_p4 = scmp.lt.s32.totalorder %s952_s14, %s1311_s4 }
  0x22   : > { %v326_v28 = vunpack.c.l.b16 %v308_v20  ;;  %v381_v44 = vunpack.c.l.b16 %v311_v33  ;;  %v314_v58 = vpack.c.bf16 %v306_v52, %v306_v52  ;;  %v353_v62 = vunpack.c.l.b16 %v309_v55  ;;  %p954_p1 = scmp.ne.s32.totalorder %s952_s14, %s953_s20  ;;  %p959_p7 = scmp.lt.s32.totalorder %s957_s27, %s953_s20 }
  0x23   : > { %v382_v45 = vunpack.c.l.b16 %v312_v34  ;;  %v354_v63 = vunpack.c.l.b16 %v310_v56  ;;  %v409_v0 = vunpack.c.l.b16 %v313_v57  ;;  %865 = vrcp.f32 %v1008_v8 }
  0x24   : > { %v327_v37 = vpack.c.b16 %v326_v28, %v325_v27  ;;  %v410_v1 = vunpack.c.l.b16 %v314_v58  ;;  %p955_p2 = pnand %p954_p1, %p1074_p5  ;;  %p960_p8 = por %p959_p7, %p958_p4 }
  0x25   : > { %v383_v53 = vpack.c.b16 %v382_v45, %v381_v44  ;;  %v355_v5 = vpack.c.b16 %v354_v63, %v353_v62 }
  0x26   : > { %v411_v6 = vpack.c.b16 %v410_v1, %v409_v0  ;;  %p956_p3 = pneg %p955_p2 }
  0x28   : > { %p961_p9 = pnand %p960_p8, %p956_p3 }
  0x29   : > { %v866_v12 = vpop.eup %865 }
  0x2a   : > { %vm502_vm1 = vweird.f32 %v866_v12 }
  0x2f   : > { %792 = vmatmul.msk.bf16.gmra.mxu0 %vm257_vm0, %v251_v14  ;;  %v436_v14 = vld [vmem:[#allocation2 + $0x8] sm:$0xff] }
  0x9c   : > { %v279_v15 = vpop.f32.mrf.mxu0 }
  0x9d   : > { %v315_v21 = vpack.c.bf16 %v279_v15, %v279_v15 }
  0x9f   : > { %v330_v29 = vunpack.c.l.b16 %v315_v21 }
  0xa3   : > { %v289_v18 = vpop.f32.mrf.mxu2  ;;  %v294_v22 = vpop.f32.mrf.mxu3 }
  0xa4   : > { %v281_v23 = vpop.f32.mrf.mxu0  ;;  %v319_v30 = vpack.c.bf16 %v289_v18, %v289_v18  ;;  %v321_v32 = vpack.c.bf16 %v294_v22, %v294_v22  ;;  %v498_v18 = vmul.f32 16.0, %v866_v12 }
  0xa5   : > { %v316_v24 = vpack.c.bf16 %v281_v23, %v281_v23 }
  0xa6   : > { %v386_v38 = vunpack.c.l.b16 %v319_v30  ;;  %v414_v41 = vunpack.c.l.b16 %v321_v32 }
  0xa7   : > { %v331_v31 = vunpack.c.l.b16 %v316_v24  ;;  %v499_v24 = vsub.f32 1.0, %v498_v18 }
  0xa9   : > { %v332_v35 = vpack.c.b16 %v331_v31, %v330_v29  ;;  %v500_v29 = vmul.f32 %v866_v12, %v499_v24 }
  0xab   : > { %v291_v36 = vpop.f32.mrf.mxu2  ;;  %344 = vmatpush.bf16.msra.mxu1 %v332_v35  ;;  %v296_v40 = vpop.f32.mrf.mxu3 }
  0xac   : > { %v320_v39 = vpack.c.bf16 %v291_v36, %v291_v36  ;;  %v284_v42 = vpop.f32.mrf.mxu0  ;;  %v322_v43 = vpack.c.bf16 %v296_v40, %v296_v40 }
  0xad   : > { %v317_v59 = vpack.c.bf16 %v284_v42, %v284_v42 }
  0xae   : > { %v387_v46 = vunpack.c.l.b16 %v320_v39  ;;  %795 = vmatmul.msk.bf16.vlgmr.msra.gmra.mxu1 %vm257_vm0, %v327_v37  ;;  %v415_v47 = vunpack.c.l.b16 %v322_v43  ;;  %v501_v37 = vadd.f32 %v866_v12, %v500_v29 }
  0xaf   : > { %v358_v2 = vunpack.c.l.b16 %v317_v59 }
  0xb0   : > { %v388_v49 = vpack.c.b16 %v387_v46, %v386_v38  ;;  %v416_v54 = vpack.c.b16 %v415_v47, %v414_v41  ;;  %v1149_v47 = vsel %vm502_vm1, %v866_v12, %v501_v37 }
  0xb2   : > { %400 = vmatpush.bf16.msrb.mxu3 %v388_v49  ;;  %428 = vmatpush.bf16.msrb.mxu1 %v416_v54 }
  0xb4   : > { %v286_v60 = vpop.f32.mrf.mxu0 }
  0xb5   : > { %797 = vmatmul.msk.bf16.vlgmr.msrb.gmra.mxu3 %vm257_vm0, %v383_v53  ;;  %v318_v61 = vpack.c.bf16 %v286_v60, %v286_v60 }
  0xb7   : > { %v359_v3 = vunpack.c.l.b16 %v318_v61 }
  0xb9   : > { %v360_v4 = vpack.c.b16 %v359_v3, %v358_v2 }
  0xbb   : > { %372 = vmatpush.bf16.msrb.mxu2 %v360_v4 }
  0xbe   : > { %796 = vmatmul.msk.bf16.vlgmr.msrb.gmra.mxu2 %vm257_vm0, %v355_v5  ;;  %798 = vmatmul.msk.bf16.vlgmr.msrb.gmra.mxu1 %vm257_vm0, %v411_v6 }
 0x12b   : > { %v346_v7 = vpop.f32.mrf.mxu1 }
 0x12c   : > { %v437_v9 = vmul.f32 0.85, %v346_v7 }
 0x12e   : > { %v1126_v11 = vadd.f32 %v437_v9, %v435_v10 }
 0x130   : > { %v453_v16 = vmax.f32 %v1126_v11, 0.0 }
 0x132   : > { %v461_v22 = vsel %vm257_vm0, %v453_v16, 0.0 }
 0x133   : > { %v348_v13 = vpop.f32.mrf.mxu1 }
 0x134   : > { %v438_v15 = vmul.f32 0.85, %v348_v13 }
 0x136   : > { %v1129_v17 = vadd.f32 %v438_v15, %v436_v14 }
 0x138   : > { %v402_v19 = vpop.f32.mrf.mxu3  ;;  %v454_v20 = vmax.f32 %v1129_v17, 0.0 }
 0x139   : > { %v441_v21 = vmul.f32 0.85, %v402_v19 }
 0x13a   : > { %v462_v23 = vsel %vm257_vm0, %v454_v20, 0.0 }
 0x13b   : > { %v463_v25 = vadd.f32 %v462_v23, %v461_v22  ;;  %v430_v26 = vpop.f32.mrf.mxu1  ;;  %v1138_v27 = vadd.f32 %v441_v21, %v435_v10 }
 0x13c   : > { %v443_v30 = vmul.f32 0.85, %v430_v26 }
 0x13d   : > { %v464_v28 = vrot.slane %v463_v25, 4  ;;  %v457_v33 = vmax.f32 %v1138_v27, 0.0 }
 0x13e   : > { %v1141_v38 = vadd.f32 %v443_v30, %v435_v10 }
 0x13f   : > { %v465_v31 = vadd.f32 %v464_v28, %v463_v25  ;;  %v479_v42 = vsel %vm257_vm0, %v457_v33, 0.0 }
 0x140   : > { %v404_v32 = vpop.f32.mrf.mxu3  ;;  %v459_v48 = vmax.f32 %v1141_v38, 0.0 }
 0x141   : > { %v442_v34 = vmul.f32 0.85, %v404_v32  ;;  %v466_v35 = vrot.slane %v465_v31, 2  ;;  %v374_v36 = vpop.f32.mrf.mxu2 }
 0x142   : > { %v439_v44 = vmul.f32 0.85, %v374_v36  ;;  %v488_v58 = vsel %vm257_vm0, %v459_v48, 0.0 }
 0x143   : > { %v1143_v39 = vadd.f32 %v442_v34, %v436_v14  ;;  %v467_v40 = vadd.f32 %v466_v35, %v465_v31  ;;  %v432_v41 = vpop.f32.mrf.mxu1 }
 0x144   : > { %v444_v45 = vmul.f32 0.85, %v432_v41  ;;  %v1157_v53 = vadd.f32 %v439_v44, %v435_v10 }
 0x145   : > { %v458_v43 = vmax.f32 %v1143_v39, 0.0  ;;  %v468_v46 = vrot.slane %v467_v40, 1 }
 0x146   : > { %v1155_v50 = vadd.f32 %v444_v45, %v436_v14  ;;  %v455_v0 = vmax.f32 %v1157_v53, 0.0 }
 0x147   : > { %v480_v49 = vsel %vm257_vm0, %v458_v43, 0.0  ;;  %v469_v51 = vadd.f32 %v468_v46, %v467_v40 }
 0x148   : > { %v481_v52 = vadd.f32 %v480_v49, %v479_v42  ;;  %v460_v54 = vmax.f32 %v1155_v50, 0.0  ;;  %v470_v7 = vsel %vm257_vm0, %v455_v0, 0.0 }
 0x149   : > { %v504_v55 = vmul.f32 %v1149_v47, %v469_v51  ;;  %v376_v57 = vpop.f32.mrf.mxu2 }
 0x14a   : > { %v482_v56 = vrot.slane %v481_v52, 4  ;;  %v489_v59 = vsel %vm257_vm0, %v460_v54, 0.0  ;;  %v440_v60 = vmul.f32 0.85, %v376_v57 }
 0x14b   : > { %v508_v61 = vadd.f32 1e-06, %v504_v55  ;;  %v490_v63 = vadd.f32 %v489_v59, %v488_v58 }
 0x14c   : > { %v483_v62 = vadd.f32 %v482_v56, %v481_v52  ;;  %v1168_v1 = vadd.f32 %v440_v60, %v436_v14 }
 0x14d   : > { %867 = vrcp.f32 %v508_v61  ;;  %v491_v3 = vrot.slane %v490_v63, 4 }
 0x14e   : > { %v484_v2 = vrot.slane %v483_v62, 2  ;;  %v456_v4 = vmax.f32 %v1168_v1, 0.0 }
 0x14f   : > { %v492_v6 = vadd.f32 %v491_v3, %v490_v63 }
 0x150   : > { %v485_v5 = vadd.f32 %v484_v2, %v483_v62  ;;  %v471_v8 = vsel %vm257_vm0, %v456_v4, 0.0 }
 0x151   : > { %v493_v10 = vrot.slane %v492_v6, 2  ;;  %v472_v12 = vadd.f32 %v471_v8, %v470_v7 }
 0x152   : > { %v486_v9 = vrot.slane %v485_v5, 1 }
 0x153   : > { %v868_v13 = vpop.eup %867  ;;  %v494_v15 = vadd.f32 %v493_v10, %v492_v6  ;;  %v473_v18 = vrot.slane %v472_v12, 4 }
 0x154   : > { %v487_v14 = vadd.f32 %v486_v9, %v485_v5  ;;  %v1179_v19 = vmul.f32 %v868_v13, %v453_v16  ;;  %v1183_v21 = vmul.f32 %v868_v13, %v454_v20 }
 0x155   : > { %v495_v23 = vrot.slane %v494_v15, 1  ;;  %v474_v24 = vadd.f32 %v473_v18, %v472_v12 }
 0x156   : > { %v506_v22 = vmul.f32 %v1149_v47, %v487_v14  ;;  %v548_v25 = vand.u32 2147483647, %v1179_v19  ;;  %v549_v26 = vand.u32 2147483647, %v1183_v21  ;;  %v524_v7 = vmax.f32 %v1179_v19, 0.0 }
 0x157   : > { %v496_v29 = vadd.f32 %v495_v23, %v494_v15  ;;  %v475_v30 = vrot.slane %v474_v24, 2  ;;  %v525_v12 = vmax.f32 %v1183_v21, 0.0  ;;  %vm532_vm3 = vcmp.ne.f32.partialorder %v1179_v19, %v1179_v19 }
 0x158   : > { %v510_v28 = vadd.f32 1e-06, %v506_v22  ;;  %v556_v31 = vsub.f32 0.0, %v548_v25  ;;  %v557_v32 = vsub.f32 0.0, %v549_v26  ;;  %vm533_vm5 = vcmp.ne.f32.partialorder %v1183_v21, %v1183_v21 }
 0x159   : > { %v507_v11 = vmul.f32 %v1149_v47, %v496_v29  ;;  %v476_v16 = vadd.f32 %v475_v30, %v474_v24 }
 0x15a   : > { %869 = vrcp.f32 %v510_v28  ;;  %v564_v17 = vmul.f32 1.442695, %v556_v31  ;;  %v566_v20 = vmul.f32 1.442695, %v557_v32 }
 0x15b   : > { %v511_v34 = vadd.f32 1e-06, %v507_v11  ;;  %v477_v35 = vrot.slane %v476_v16, 1 }
 0x15c   : > { %871 = vpow2.f32 %v564_v17 }
 0x15d   : > { %873 = vpow2.f32 %v566_v20  ;;  %v478_v37 = vadd.f32 %v477_v35, %v476_v16 }
 0x15e   : > { %875 = vrcp.f32 %v511_v34 }
 0x15f   : > { %v505_v46 = vmul.f32 %v1149_v47, %v478_v37 }
 0x160   : > { %v870_v36 = vpop.eup %869 }
 0x161   : > { %v1191_v40 = vmul.f32 %v870_v36, %v457_v33  ;;  %v1195_v41 = vmul.f32 %v870_v36, %v458_v43  ;;  %v509_v43 = vadd.f32 1e-06, %v505_v46 }
 0x162   : > { %v872_v42 = vpop.eup %871 }
 0x163   : > { %v552_v44 = vand.u32 2147483647, %v1191_v40  ;;  %v553_v45 = vand.u32 2147483647, %v1195_v41  ;;  %v874_v49 = vpop.eup %873  ;;  %v580_v51 = vadd.f32 1.0, %v872_v42  ;;  %v583_v55 = vmul.f32 -0.5, %v872_v42 }
 0x164   : > { %v876_v52 = vpop.eup %875  ;;  %v589_v56 = vadd.f32 1.0, %v874_v49  ;;  %v592_v33 = vmul.f32 -0.5, %v874_v49  ;;  %v586_v61 = vand.u32 2147483647, %v872_v42  ;;  %v595_v63 = vand.u32 2147483647, %v874_v49 }
 0x165   : > { %v560_v27 = vsub.f32 0.0, %v552_v44  ;;  %877 = vlog2.f32 %v580_v51  ;;  %v561_v57 = vsub.f32 0.0, %v553_v45  ;;  %v1202_v59 = vmul.f32 %v876_v52, %v459_v48 }
 0x166   : > { %879 = vlog2.f32 %v589_v56  ;;  %v1206_v47 = vmul.f32 %v876_v52, %v460_v54  ;;  %v584_v60 = vadd.f32 1.0, %v583_v55  ;;  %v593_v62 = vadd.f32 1.0, %v592_v33 }
 0x167   : > { %v572_v39 = vmul.f32 1.442695, %v560_v27  ;;  %v574_v58 = vmul.f32 1.442695, %v561_v57  ;;  %v554_v2 = vand.u32 2147483647, %v1202_v59  ;;  %vm536_vm8 = vcmp.ne.f32.partialorder %v1191_v40, %v1191_v40 }
 0x168   : > { %v555_v3 = vand.u32 2147483647, %v1206_v47  ;;  %v585_v50 = vmul.f32 %v872_v42, %v584_v60  ;;  %vm587_vm2 = vcmp.lt.f32.partialorder %v586_v61, 0.0004427343  ;;  %v594_v9 = vmul.f32 %v874_v49, %v593_v62 }
 0x169   : > { %881 = vpow2.f32 %v572_v39  ;;  %v562_v54 = vsub.f32 0.0, %v554_v2  ;;  %vm596_vm4 = vcmp.lt.f32.partialorder %v595_v63, 0.0004427343  ;;  %v528_v53 = vmax.f32 %v1191_v40, 0.0 }
 0x16a   : > { %883 = vpow2.f32 %v574_v58  ;;  %v563_v6 = vsub.f32 0.0, %v555_v3  ;;  %vm537_vm9 = vcmp.ne.f32.partialorder %v1195_v41, %v1195_v41  ;;  %vm538_vm12 = vcmp.ne.f32.partialorder %v1202_v59, %v1202_v59 }
 0x16b   : > { %885 = vrcp.f32 %v509_v43  ;;  %v878_v5 = vpop.eup %877  ;;  %v576_v23 = vmul.f32 1.442695, %v562_v54  ;;  %vm539_vm13 = vcmp.ne.f32.partialorder %v1206_v47, %v1206_v47 }
 0x16c   : > { %v880_v38 = vpop.eup %879  ;;  %v582_v48 = vmul.f32 0.6931472, %v878_v5  ;;  %v578_v29 = vmul.f32 1.442695, %v563_v6 }
 0x16d   : > { %v591_v8 = vmul.f32 0.6931472, %v880_v38 }
 0x16e   : > { %v588_v13 = vsel %vm587_vm2, %v585_v50, %v582_v48 }
 0x16f   : > { %v882_v10 = vpop.eup %881  ;;  %v597_v15 = vsel %vm596_vm4, %v594_v9, %v591_v8  ;;  %v652_v18 = vadd.f32 %v588_v13, %v524_v7  ;;  %v531_v8 = vmax.f32 %v1206_v47, 0.0 }
 0x170   : > { %v884_v14 = vpop.eup %883  ;;  %v616_v22 = vadd.f32 1.0, %v882_v10  ;;  %v653_v25 = vadd.f32 %v597_v15, %v525_v12  ;;  %v619_v26 = vmul.f32 -0.5, %v882_v10 }
 0x171   : > { %v886_v24 = vpop.eup %885  ;;  %v625_v28 = vadd.f32 1.0, %v884_v14  ;;  %v660_v30 = vsel %vm532_vm3, %v1179_v19, %v652_v18  ;;  %v628_v31 = vmul.f32 -0.5, %v884_v14  ;;  %v622_v19 = vand.u32 2147483647, %v882_v10 }
 0x172   : > { %887 = vlog2.f32 %v616_v22  ;;  %v661_v32 = vsel %vm533_vm5, %v1183_v21, %v653_v25  ;;  %668 = vst.msk [vmem:[%s1221_s7] sm:$0xff] %vm257_vm0, %v660_v30  ;;  %v1229_v11 = vmul.f32 %v886_v24, %v455_v0  ;;  %v620_v16 = vadd.f32 1.0, %v619_v26 }
 0x173   : > { %889 = vlog2.f32 %v625_v28  ;;  %669 = vst.msk [vmem:[%s1221_s7 + $0x8] sm:$0xff] %vm257_vm0, %v661_v32  ;;  %v1233_v21 = vmul.f32 %v886_v24, %v456_v4  ;;  %v629_v17 = vadd.f32 1.0, %v628_v31  ;;  %v631_v20 = vand.u32 2147483647, %v884_v14 }
 0x174   : > { %891 = vpow2.f32 %v576_v23  ;;  %v550_v34 = vand.u32 2147483647, %v1229_v11  ;;  %v529_v0 = vmax.f32 %v1195_v41, 0.0  ;;  %v621_v45 = vmul.f32 %v882_v10, %v620_v16 }
 0x175   : > { %893 = vpow2.f32 %v578_v29  ;;  %v551_v35 = vand.u32 2147483647, %v1233_v21  ;;  %vm623_vm6 = vcmp.lt.f32.partialorder %v622_v19, 0.0004427343  ;;  %v630_v4 = vmul.f32 %v884_v14, %v629_v17 }
 0x176   : > { %v558_v37 = vsub.f32 0.0, %v550_v34  ;;  %vm632_vm7 = vcmp.lt.f32.partialorder %v631_v20, 0.0004427343  ;;  %vm534_vm15 = vcmp.ne.f32.partialorder %v1229_v11, %v1229_v11  ;;  %vm535_vm2 = vcmp.ne.f32.partialorder %v1233_v21, %v1233_v21 }
 0x177   : > { %v559_v55 = vsub.f32 0.0, %v551_v35  ;;  %v527_v35 = vmax.f32 %v1233_v21, 0.0 }
 0x178   : > { %v888_v36 = vpop.eup %887  ;;  %v568_v56 = vmul.f32 1.442695, %v558_v37 }
 0x179   : > { %v890_v42 = vpop.eup %889  ;;  %v618_v44 = vmul.f32 0.6931472, %v888_v36  ;;  %v570_v62 = vmul.f32 1.442695, %v559_v55 }
 0x17a   : > { %v892_v46 = vpop.eup %891  ;;  %v627_v1 = vmul.f32 0.6931472, %v890_v42 }
 0x17b   : > { %v894_v49 = vpop.eup %893  ;;  %v624_v51 = vsel %vm623_vm6, %v621_v45, %v618_v44  ;;  %v634_v52 = vadd.f32 1.0, %v892_v46  ;;  %v637_v57 = vmul.f32 -0.5, %v892_v46  ;;  %v640_v2 = vand.u32 2147483647, %v892_v46 }
 0x17c   : > { %v633_v27 = vsel %vm632_vm7, %v630_v4, %v627_v1  ;;  %v656_v33 = vadd.f32 %v624_v51, %v528_v53  ;;  %v643_v39 = vadd.f32 1.0, %v894_v49  ;;  %v646_v58 = vmul.f32 -0.5, %v894_v49 }
 0x17d   : > { %v657_v43 = vadd.f32 %v633_v27, %v529_v0  ;;  %895 = vlog2.f32 %v634_v52  ;;  %v638_v63 = vadd.f32 1.0, %v637_v57  ;;  %v649_v5 = vand.u32 2147483647, %v894_v49 }
 0x17e   : > { %v664_v60 = vsel %vm536_vm8, %v1191_v40, %v656_v33  ;;  %897 = vlog2.f32 %v643_v39  ;;  %v647_v3 = vadd.f32 1.0, %v646_v58  ;;  %v530_v40 = vmax.f32 %v1202_v59, 0.0 }
 0x17f   : > { %v665_v61 = vsel %vm537_vm9, %v1195_v41, %v657_v43  ;;  %672 = vst.msk [vmem:[%s1221_s7 + $0x20] sm:$0xff] %vm257_vm0, %v664_v60  ;;  %899 = vpow2.f32 %v568_v56  ;;  %v639_v54 = vmul.f32 %v892_v46, %v638_v63  ;;  %vm641_vm10 = vcmp.lt.f32.partialorder %v640_v2, 0.0004427343 }
 0x180   : > { %673 = vst.msk [vmem:[%s1221_s7 + $0x28] sm:$0xff] %vm257_vm0, %v665_v61  ;;  %901 = vpow2.f32 %v570_v62  ;;  %v648_v7 = vmul.f32 %v894_v49, %v647_v3  ;;  %vm650_vm11 = vcmp.lt.f32.partialorder %v649_v5, 0.0004427343 }
 0x183   : > { %v896_v38 = vpop.eup %895 }
 0x184   : > { %v898_v48 = vpop.eup %897  ;;  %v636_v50 = vmul.f32 0.6931472, %v896_v38 }
 0x185   : > { %v900_v6 = vpop.eup %899  ;;  %v645_v41 = vmul.f32 0.6931472, %v898_v48 }
 0x186   : > { %v642_v9 = vsel %vm641_vm10, %v639_v54, %v636_v50  ;;  %v598_v10 = vadd.f32 1.0, %v900_v6  ;;  %v902_v12 = vpop.eup %901  ;;  %v601_v15 = vmul.f32 -0.5, %v900_v6  ;;  %v604_v28 = vand.u32 2147483647, %v900_v6 }
 0x187   : > { %v651_v13 = vsel %vm650_vm11, %v648_v7, %v645_v41  ;;  %v658_v14 = vadd.f32 %v642_v9, %v530_v40  ;;  %v607_v23 = vadd.f32 1.0, %v902_v12  ;;  %v610_v25 = vmul.f32 -0.5, %v902_v12 }
 0x188   : > { %v659_v18 = vadd.f32 %v651_v13, %v531_v8  ;;  %903 = vlog2.f32 %v598_v10  ;;  %v602_v26 = vadd.f32 1.0, %v601_v15  ;;  %v613_v16 = vand.u32 2147483647, %v902_v12 }
 0x189   : > { %v666_v22 = vsel %vm538_vm12, %v1202_v59, %v658_v14  ;;  %905 = vlog2.f32 %v607_v23  ;;  %v611_v30 = vadd.f32 1.0, %v610_v25  ;;  %v526_v59 = vmax.f32 %v1229_v11, 0.0 }
 0x18a   : > { %v667_v24 = vsel %vm539_vm13, %v1206_v47, %v659_v18  ;;  %674 = vst.msk [vmem:[%s1221_s7 + $0x30] sm:$0xff] %vm257_vm0, %v666_v22  ;;  %v603_v32 = vmul.f32 %v900_v6, %v602_v26  ;;  %vm605_vm14 = vcmp.lt.f32.partialorder %v604_v28, 0.0004427343  ;;  %vm614_vm1 = vcmp.lt.f32.partialorder %v613_v16, 0.0004427343 }
 0x18b   : > { %675 = vst.msk [vmem:[%s1221_s7 + $0x38] sm:$0xff] %vm257_vm0, %v667_v24  ;;  %v612_v20 = vmul.f32 %v902_v12, %v611_v30 }
 0x18e   : > { %v904_v29 = vpop.eup %903 }
 0x18f   : > { %v600_v31 = vmul.f32 0.6931472, %v904_v29  ;;  %v906_v47 = vpop.eup %905 }
 0x190   : > { %v609_v17 = vmul.f32 0.6931472, %v906_v47 }
 0x191   : > { %v606_v19 = vsel %vm605_vm14, %v603_v32, %v600_v31 }
 0x192   : > { %v654_v34 = vadd.f32 %v606_v19, %v526_v59  ;;  %v615_v36 = vsel %vm614_vm1, %v612_v20, %v609_v17 }
 0x193   : > { %v655_v42 = vadd.f32 %v615_v36, %v527_v35 }
 0x194   : > { %v662_v37 = vsel %vm534_vm15, %v1229_v11, %v654_v34 }
 0x195   : > { %670 = vst.msk [vmem:[%s1221_s7 + $0x10] sm:$0xff] %vm257_vm0, %v662_v37  ;;  %v663_v53 = vsel %vm535_vm2, %v1233_v21, %v655_v42 }
 0x196   : > { %671 = vst.msk [vmem:[%s1221_s7 + $0x18] sm:$0xff] %vm257_vm0, %v663_v53 }
 0x197   : > { %964 = shalt.err (!%p961_p9)
}
 0x198   : > { %s1009_s30 = smov 128   ;;  %s1010_s5 = smov 8  }
 0x199   : > { %814 = dma.vmem_to_hbm [thread:$0]  (%p1074_p5), %s691_s19, 1024, %s693_s12, %s677_s13, %s1009_s30, %s1009_s30, %s1010_s5  }
 0x19a PF: > { %p826_p10 = scmp.ge.s32.totalorder %s1003_s18, 2  ;;  %s707_s6 = sand.u32 1, %s991_s15  }
 0x19b   : > { %s708_s7 = scalar_lea.sflag [#allocation4], %s707_s6 }
 0x19c   : > { %p821_p11 = pnand %p826_p10, %p1078_p6 }
 0x19e   : > { %p822_p12 = pneg %p821_p11 }
 0x1a0   : > { %986 = dma.done.wait (%p822_p12), %s708_s7, 1024  }
 0x1a1   : > { %988 = vsyncadd (%p822_p12), %s708_s7, 4294966272  ;;  %p15_p13 = scmp.ge.s32.totalorder %s1061_s21, 4   ;;  %s1314_s15 = smov %s995_s16 }
 0x1a2   : > { %s1315_s16 = smov %s999_s17  ;;  %s1316_s17 = smov %s1072_s24 }
 0x1a3   : > { %s1317_s18 = smov %s1061_s21  ;;  %17 = sbr.rel (!%p15_p13) target bundleno = 4 (0x4), region = 79 }
 0x1a8   :  { %714 = vsyncpa [#allocation3], 1 }
 0x1a9   :  { %716 = vsyncpa [#allocation3 + $0x1], 1 }
 0x1aa   :  { %717 = vsyncpa [#allocation4], 1 }
 0x1ab   :  { %719 = vsyncpa [#allocation4 + $0x1], 1 }

</bundles_post_ra>
